<compile_context>
chip_gen: v7x
topology: tpu7x:2x2x1
jax: 0.10.0
libtpu: 0.0.40
codegen_flags: <defaults>
</compile_context>

<pallas_src>
import functools

import numpy as np
import jax
import jax.numpy as jnp
from jax.experimental import pallas as pl
from jax.experimental.pallas import tpu as pltpu

_VMEM_LIMIT = 48 * 1024 * 1024


def _largest_divisor(n, cap):
    """Largest divisor of n that is <= cap and (multiple of 8 or == n)."""
    cap = min(cap, n)
    for t in range(cap, 0, -1):
        if n % t == 0 and (t % 8 == 0 or t == n):
            return t
    return n


# ---------------------------------------------------------------------------
# Kernel A: 1x1 conv + folded BN + ReLU   (rows = N*H*W, channels on lanes)
# ---------------------------------------------------------------------------
def _conv1x1_bn_relu_kernel(x_ref, w_ref, b_ref, o_ref):
    x = x_ref[...].astype(jnp.bfloat16)           # bf16 into the MXU
    y = jax.lax.dot_general(x, w_ref[...], (((1,), (0,)), ((), ())),
                            preferred_element_type=jnp.float32)
    y = jnp.maximum(y + b_ref[...], 0.0)
    o_ref[...] = y.astype(o_ref.dtype)


def conv1x1_bn_relu(x2d, w_bf16, bias_f32, *, tm=512):
    M, cin = x2d.shape
    cout = w_bf16.shape[1]
    tm = _largest_divisor(M, tm)
    return pl.pallas_call(
        _conv1x1_bn_relu_kernel,
        out_shape=jax.ShapeDtypeStruct((M, cout), jnp.bfloat16),
        grid=(M // tm,),
        in_specs=[
            pl.BlockSpec((tm, cin), lambda i: (i, 0)),
            pl.BlockSpec((cin, cout), lambda i: (0, 0)),
            pl.BlockSpec((1, cout), lambda i: (0, 0)),
        ],
        out_specs=pl.BlockSpec((tm, cout), lambda i: (i, 0)),
        compiler_params=pltpu.CompilerParams(
            dimension_semantics=("parallel",),
            vmem_limit_bytes=_VMEM_LIMIT),
    )(x2d, w_bf16, bias_f32)


# ---------------------------------------------------------------------------
# Kernel B: fused [ConvTranspose2d(3, s=2, p=1, op=1) + BN + ReLU]
#                 + [1x1 conv + BN + ReLU]
#
# Phase decomposition (oh = 2i + ph, ow = 2j + pw), W_d[ci, co, kh, kw]:
#   y(0,0)[i,j] = x[i  ,j  ]·W[1,1]
#   y(0,1)[i,j] = x[i  ,j+1]·W[1,0] + x[i  ,j]·W[1,2]
#   y(1,0)[i,j] = x[i+1,j  ]·W[0,1] + x[i  ,j]·W[2,1]
#   y(1,1)[i,j] = x[i+1,j+1]·W[0,0] + x[i+1,j]·W[0,2] + x[i,j+1]·W[2,0] + x[i,j]·W[2,2]
# The 9 taps are issued as 4 merged matmuls (one per shifted source).
# ---------------------------------------------------------------------------
def _deconv_conv3_kernel(cur_ref, nxt_ref, wa_ref, wb_ref, wc_ref, wd_ref,
                         b2_ref, w3_ref, b3_ref, o_ref, *, th, W, Cm, F):
    M = th * W
    cur = cur_ref[0]                                   # (th, W+1, Cm) bf16
    nxt = nxt_ref[0]                                   # (th, W+1, Cm) bf16
    a = cur[:, :W, :].reshape(M, Cm)                   # x[i,   j  ]
    b = cur[:, 1:, :].reshape(M, Cm)                   # x[i,   j+1]
    c = nxt[:, :W, :].reshape(M, Cm)                   # x[i+1, j  ]
    d = nxt[:, 1:, :].reshape(M, Cm)                   # x[i+1, j+1]

    def mm(lhs, w_ref_):
        return jax.lax.dot_general(lhs, w_ref_[...], (((1,), (0,)), ((), ())),
                                   preferred_element_type=jnp.float32)

    pa = mm(a, wa_ref)     # (M, 4*Cm): taps [k11, k12, k21, k22]
    pb = mm(b, wb_ref)     # (M, 2*Cm): taps [k10, k20]
    pc = mm(c, wc_ref)     # (M, 2*Cm): taps [k01, k02]
    pd = mm(d, wd_ref)     # (M,   Cm): tap   k00

    bias2 = b2_ref[...]
    y00 = pa[:, 0 * Cm:1 * Cm] + bias2
    y01 = pa[:, 1 * Cm:2 * Cm] + pb[:, 0:Cm] + bias2
    y10 = pa[:, 2 * Cm:3 * Cm] + pc[:, 0:Cm] + bias2
    y11 = pa[:, 3 * Cm:4 * Cm] + pb[:, Cm:2 * Cm] + pc[:, Cm:2 * Cm] + pd + bias2

    y = jnp.concatenate([y00, y01, y10, y11], axis=0)  # (4M, Cm)
    y = jnp.maximum(y, 0.0).astype(jnp.bfloat16)       # deconv + BN2 + ReLU

    z = mm(y, w3_ref) + b3_ref[...]                    # conv3 (one wide matmul)
    z = jnp.maximum(z, 0.0).astype(o_ref.dtype)        # BN3 + ReLU

    z00 = z[0 * M:1 * M].reshape(th, W, F)
    z01 = z[1 * M:2 * M].reshape(th, W, F)
    z10 = z[2 * M:3 * M].reshape(th, W, F)
    z11 = z[3 * M:4 * M].reshape(th, W, F)

    # out[n, i, ph, j, pw*F:(pw+1)*F] == final[n, 2i+ph, 2j+pw, :]
    o_ref[0, :, 0, :, :] = jnp.concatenate([z00, z01], axis=-1)
    o_ref[0, :, 1, :, :] = jnp.concatenate([z10, z11], axis=-1)


def deconv_conv_fused(cur, nxt, wa, wb, wc, wdd, b2, w3, b3, *, th):
    N, H, Wp1, Cm = cur.shape
    W = Wp1 - 1
    F = w3.shape[1]
    kern = functools.partial(_deconv_conv3_kernel, th=th, W=W, Cm=Cm, F=F)
    return pl.pallas_call(
        kern,
        out_shape=jax.ShapeDtypeStruct((N, H, 2, W, 2 * F), jnp.float32),
        grid=(N, H // th),
        in_specs=[
            pl.BlockSpec((1, th, Wp1, Cm), lambda n, t: (n, t, 0, 0)),
            pl.BlockSpec((1, th, Wp1, Cm), lambda n, t: (n, t, 0, 0)),
            pl.BlockSpec((Cm, 4 * Cm), lambda n, t: (0, 0)),
            pl.BlockSpec((Cm, 2 * Cm), lambda n, t: (0, 0)),
            pl.BlockSpec((Cm, 2 * Cm), lambda n, t: (0, 0)),
            pl.BlockSpec((Cm, Cm), lambda n, t: (0, 0)),
            pl.BlockSpec((1, Cm), lambda n, t: (0, 0)),
            pl.BlockSpec((Cm, F), lambda n, t: (0, 0)),
            pl.BlockSpec((1, F), lambda n, t: (0, 0)),
        ],
        out_specs=pl.BlockSpec((1, th, 2, W, 2 * F),
                               lambda n, t: (n, t, 0, 0, 0)),
        compiler_params=pltpu.CompilerParams(
            dimension_semantics=("parallel", "parallel"),
            vmem_limit_bytes=_VMEM_LIMIT),
    )(cur, nxt, wa, wb, wc, wdd, b2, w3, b3)


# ---------------------------------------------------------------------------
# Parameters, BN folding, forward pass, pure-JAX reference
# ---------------------------------------------------------------------------
def init_params(key, in_channels, n_filters):
    cm = in_channels // 4
    ks = jax.random.split(key, 24)
    it = iter(range(24))
    nk = lambda: ks[next(it)]

    def bn(c):
        return dict(
            gamma=1.0 + 0.1 * jax.random.normal(nk(), (c,), jnp.float32),
            beta=0.1 * jax.random.normal(nk(), (c,), jnp.float32),
            mean=0.1 * jax.random.normal(nk(), (c,), jnp.float32),
            var=1.0 + 0.1 * jax.random.uniform(nk(), (c,), jnp.float32))

    return dict(
        w1=0.1 * jax.random.normal(nk(), (in_channels, cm), jnp.float32),
        b1=0.1 * jax.random.normal(nk(), (cm,), jnp.float32),
        bn1=bn(cm),
        wd=0.1 * jax.random.normal(nk(), (cm, cm, 3, 3), jnp.float32),  # (ci,co,kh,kw)
        b2=0.1 * jax.random.normal(nk(), (cm,), jnp.float32),
        bn2=bn(cm),
        w3=0.1 * jax.random.normal(nk(), (cm, n_filters), jnp.float32),
        b3=0.1 * jax.random.normal(nk(), (n_filters,), jnp.float32),
        bn3=bn(n_filters))


def fold_params(p, eps=1e-5):
    def fold(w, b, bn):                       # last axis of w is cout
        s = bn["gamma"] / jnp.sqrt(bn["var"] + eps)
        return w * s, (b - bn["mean"]) * s + bn["beta"]

    bf = jnp.bfloat16
    w1f, b1f = fold(p["w1"], p["b1"], p["bn1"])

    s2 = p["bn2"]["gamma"] / jnp.sqrt(p["bn2"]["var"] + eps)
    wd = p["wd"] * s2[None, :, None, None]                  # fold BN2 scale on co
    b2f = (p["b2"] - p["bn2"]["mean"]) * s2 + p["bn2"]["beta"]
    tap = lambda kh, kw: wd[:, :, kh, kw]
    wa = jnp.concatenate([tap(1, 1), tap(1, 2), tap(2, 1), tap(2, 2)], axis=1)
    wb = jnp.concatenate([tap(1, 0), tap(2, 0)], axis=1)
    wc = jnp.concatenate([tap(0, 1), tap(0, 2)], axis=1)
    wdd = tap(0, 0)

    w3f, b3f = fold(p["w3"], p["b3"], p["bn3"])

    return dict(
        w1f=w1f.astype(bf), b1f=b1f[None, :].astype(jnp.float32),
        wa=wa.astype(bf), wb=wb.astype(bf), wc=wc.astype(bf), wdd=wdd.astype(bf),
        b2f=b2f[None, :].astype(jnp.float32),
        w3f=w3f.astype(bf), b3f=b3f[None, :].astype(jnp.float32))


def decoder_block_forward(x_nchw, fp):
    N, cin, H, W = x_nchw.shape
    cm = fp["w1f"].shape[1]
    F = fp["w3f"].shape[1]

    x = jnp.transpose(x_nchw, (0, 2, 3, 1))                 # NHWC (channels on lanes)

    # conv1 + BN1 + ReLU (1x1 conv == row matmul); bf16 result feeds kernel B.
    h1 = conv1x1_bn_relu(x.reshape(N * H * W, cin), fp["w1f"], fp["b1f"])
    h1 = h1.reshape(N, H, W, cm)

    # Single bottom/right zero pad supplies the +1 halo the stride-2 deconv
    # needs; "next-row" view avoids overlapping BlockSpecs in the row-tiled grid.
    h1p = jnp.pad(h1, ((0, 0), (0, 1), (0, 1), (0, 0)))
    cur = h1p[:, :H]                                        # rows i
    nxt = h1p[:, 1:]                                        # rows i + 1

    th = _largest_divisor(H, 8)
    out = deconv_conv_fused(cur, nxt, fp["wa"], fp["wb"], fp["wc"], fp["wdd"],
                            fp["b2f"], fp["w3f"], fp["b3f"], th=th)
    out = out.reshape(N, 2 * H, 2 * W, F)                   # free row-major view
    # TODO(synk): NHWC-consuming downstream code could skip this final transpose.
    return jnp.transpose(out, (0, 3, 1, 2))                 # NCHW to match PyTorch


def reference(x_nchw, p, eps=1e-5):
    hp = jax.lax.Precision.HIGHEST
    x = jnp.transpose(x_nchw, (0, 2, 3, 1))

    def bn(v, q):
        return (v - q["mean"]) / jnp.sqrt(q["var"] + eps) * q["gamma"] + q["beta"]

    h = jnp.einsum("nhwc,cm->nhwm", x, p["w1"], precision=hp) + p["b1"]
    h = jnp.maximum(bn(h, p["bn1"]), 0.0)

    # ConvTranspose2d(3, stride=2, padding=1, output_padding=1) ==
    # lhs-dilated conv with spatially flipped kernel and (1, 2) padding.
    wf = jnp.transpose(jnp.flip(p["wd"], axis=(2, 3)), (2, 3, 0, 1))  # HWIO
    y = jax.lax.conv_general_dilated(
        h, wf, window_strides=(1, 1), padding=[(1, 2), (1, 2)],
        lhs_dilation=(2, 2), rhs_dilation=(1, 1),
        dimension_numbers=("NHWC", "HWIO", "NHWC"), precision=hp)
    y = jnp.maximum(bn(y + p["b2"], p["bn2"]), 0.0)

    z = jnp.einsum("nhwm,mf->nhwf", y, p["w3"], precision=hp) + p["b3"]
    z = jnp.maximum(bn(z, p["bn3"]), 0.0)
    return jnp.transpose(z, (0, 3, 1, 2))


if __name__ == "__main__":
    N, Cin, H, W = 2, 32, 16, 16          # x: NCHW; in_channels // 4 = 8
    n_filters = 32

    key = jax.random.PRNGKey(0)
    kx, kp = jax.random.split(key)
    x = jax.random.normal(kx, (N, Cin, H, W), jnp.float32)
    params = init_params(kp, Cin, n_filters)
    fp = fold_params(params)

    out = jax.block_until_ready(decoder_block_forward(x, fp))
    assert out.shape == (N, n_filters, 2 * H, 2 * W), out.shape

    ref = jax.block_until_ready(reference(x, params))
    err = float(jnp.max(jnp.abs(out - ref)))
    # bf16 MXU operands vs f32 HIGHEST reference -> loose tolerance.
    assert np.allclose(np.asarray(out), np.asarray(ref), atol=5e-2, rtol=5e-2), err

    print("KERNEL_OK")
</pallas_src>

<mosaic_0001>
module attributes {stable_mosaic.version = 11 : i64} {
  func.func @_conv1x1_bn_relu_kernel(%arg0: i32, %arg1: memref<512x32xf32, #tpu.memory_space<vmem>>, %arg2: memref<32x8xbf16, #tpu.memory_space<vmem>>, %arg3: memref<1x8xf32, #tpu.memory_space<vmem>>, %arg4: memref<512x8xbf16, #tpu.memory_space<vmem>>) attributes {dimension_semantics = [#tpu.dimension_semantics<parallel>], iteration_bounds = array<i64: 1>, scalar_prefetch = 0 : i64, scratch_operands = 0 : i64, tpu.core_type = #tpu.core_type<tc>, window_params = [{transform_indices = @transform_0, window_bounds = array<i64: 512, 32>}, {pipeline_mode = #tpu.pipeline_mode<synchronous>, transform_indices = @transform_1, window_bounds = array<i64: 32, 8>}, {pipeline_mode = #tpu.pipeline_mode<synchronous>, transform_indices = @transform_2, window_bounds = array<i64: 1, 8>}, {transform_indices = @transform_3, window_bounds = array<i64: 512, 8>}]} {
    %c0 = arith.constant 0 : index
    %c0_0 = arith.constant 0 : index
    %0 = vector.load %arg1[%c0, %c0_0] : memref<512x32xf32, #tpu.memory_space<vmem>>, vector<512x32xf32>
    %1 = arith.truncf %0 : vector<512x32xf32> to vector<512x32xbf16>
    %c0_1 = arith.constant 0 : index
    %c0_2 = arith.constant 0 : index
    %2 = vector.load %arg2[%c0_1, %c0_2] : memref<32x8xbf16, #tpu.memory_space<vmem>>, vector<32x8xbf16>
    %cst = arith.constant dense<0.000000e+00> : vector<512x8xf32>
    %3 = tpu.matmul %1, %2, %cst {dimension_numbers = #tpu.dot_dimension_numbers<[1], [0], [0], [1], [0, 0, 1, 1], [], []>} : vector<512x32xbf16>, vector<32x8xbf16>, vector<512x8xf32> -> vector<512x8xf32>
    %c0_3 = arith.constant 0 : index
    %c0_4 = arith.constant 0 : index
    %4 = vector.load %arg3[%c0_3, %c0_4] : memref<1x8xf32, #tpu.memory_space<vmem>>, vector<1x8xf32>
    %5 = vector.broadcast %4 : vector<1x8xf32> to vector<512x8xf32>
    %6 = arith.addf %3, %5 : vector<512x8xf32>
    %cst_5 = arith.constant 0.000000e+00 : f32
    %7 = vector.broadcast %cst_5 : f32 to vector<512x8xf32>
    %8 = arith.maximumf %6, %7 : vector<512x8xf32>
    %9 = arith.truncf %8 : vector<512x8xf32> to vector<512x8xbf16>
    %c0_6 = arith.constant 0 : index
    %c0_7 = arith.constant 0 : index
    %10 = vector.load %arg4[%c0_6, %c0_7] : memref<512x8xbf16, #tpu.memory_space<vmem>>, vector<512x8xbf16>
    tpu.vector_store %arg4[%c0_6, %c0_7], %9 {strides = array<i32>} : memref<512x8xbf16, #tpu.memory_space<vmem>>, vector<512x8xbf16>,
    return
  }
  func.func @transform_0(%arg0: i32) -> (i32, i32) {
    %c0_i32 = arith.constant 0 : i32
    %c0_i32_0 = arith.constant 0 : i32
    return %arg0, %c0_i32 : i32, i32
  }
  func.func @transform_1(%arg0: i32) -> (i32, i32) {
    %c0_i32 = arith.constant 0 : i32
    %c0_i32_0 = arith.constant 0 : i32
    %c0_i32_1 = arith.constant 0 : i32
    return %c0_i32, %c0_i32_0 : i32, i32
  }
  func.func @transform_2(%arg0: i32) -> (i32, i32) {
    %c0_i32 = arith.constant 0 : i32
    %c0_i32_0 = arith.constant 0 : i32
    %c0_i32_1 = arith.constant 0 : i32
    return %c0_i32, %c0_i32_0 : i32, i32
  }
  func.func @transform_3(%arg0: i32) -> (i32, i32) {
    %c0_i32 = arith.constant 0 : i32
    %c0_i32_0 = arith.constant 0 : i32
    return %arg0, %c0_i32 : i32, i32
  }
}

</mosaic_0001>

<bundles_post_ra>
// kernel: tpu_custom_call.1
= control target key start
LH: loop header
LB: loop body
LE: loop exit
PB: predicated region body
PF: predicated region fallthrough
CT: control target
= control target key end

     0   :  { %vm134_vm0 = vcmask 261120   ;;  %vm840_vm1 = vcmask 60416   ;;  %s1755_s1 = inlined_call_operand.vmem [shape: bf16[32,8], index: 1, kind: input, shape index: {}]   ;;  %s1756_s0 = inlined_call_operand.vmem [shape: f32[512,32], index: 0, kind: input, shape index: {}]   ;;  %s1757_s2 = inlined_call_operand.vmem [shape: f32[1,8], index: 2, kind: input, shape index: {}]   ;;  %s1758_s3 = inlined_call_operand.vmem [shape: bf16[512,8], index: 3, kind: output, shape index: {}]  }
   0x1   :  { %v1178_v0 = vld [vmem:[%s1755_s1] sm:$0xff]   ;;  %v1179_v1 = vld [vmem:[%s1755_s1 + $0x8] sm:$0xff]   ;;  %v17_v7 = vld [vmem:[%s1756_s0 + $0x10] sm:$0xff] }
   0x2   :  { %1106 = vmatprep.subr.bf16.mxu0 %v1178_v0  ;;  %1174 = vmatprep.subr.bf16.mxu1 %v1178_v0  ;;  %v15_v2 = vld [vmem:[%s1756_s0] sm:$0xff]  ;;  %v16_v3 = vld [vmem:[%s1756_s0 + $0x8] sm:$0xff]  ;;  %v18_v8 = vld [vmem:[%s1756_s0 + $0x18] sm:$0xff] }
   0x3   :  { %v47_v4 = vld [vmem:[%s1756_s0 + $0x100] sm:$0xff]  ;;  %1107 = vmatpush3.bf16.msra.mxu0 %v1178_v0  ;;  %1176 = vmatpush3.bf16.msra.mxu1 %v1178_v0  ;;  %v79_v5 = vpack.c.bf16 %v16_v3, %v15_v2  ;;  %v48_v6 = vld [vmem:[%s1756_s0 + $0x108] sm:$0xff]  ;;  %v49_v10 = vld [vmem:[%s1756_s0 + $0x110] sm:$0xff]  ;;  %v80_v16 = vpack.c.bf16 %v18_v8, %v17_v7 }
   0x4   :  { %1108 = vmatprep.subr.bf16.mxu0 %v1179_v1  ;;  %1175 = vmatprep.subr.bf16.mxu1 %v1179_v1  ;;  %v95_v9 = vpack.c.bf16 %v48_v6, %v47_v4  ;;  %v50_v11 = vld [vmem:[%s1756_s0 + $0x118] sm:$0xff]  ;;  %v19_v12 = vld [vmem:[%s1756_s0 + $0x20] sm:$0xff]  ;;  %v20_v13 = vld [vmem:[%s1756_s0 + $0x28] sm:$0xff] }
   0x5   :  { %1110 = vmatprep.mubr.msk.bf16.mxu0 %vm134_vm0, %v79_v5  ;;  %v51_v14 = vld [vmem:[%s1756_s0 + $0x120] sm:$0xff]  ;;  %v52_v15 = vld [vmem:[%s1756_s0 + $0x128] sm:$0xff]  ;;  %v96_v17 = vpack.c.bf16 %v50_v11, %v49_v10  ;;  %v81_v18 = vpack.c.bf16 %v20_v13, %v19_v12  ;;  %v21_v20 = vld [vmem:[%s1756_s0 + $0x30] sm:$0xff] }
   0x6   :  { %1142 = vmatprep.mubr.msk.bf16.mxu1 %vm134_vm0, %v95_v9  ;;  %v97_v19 = vpack.c.bf16 %v52_v15, %v51_v14  ;;  %v22_v21 = vld [vmem:[%s1756_s0 + $0x38] sm:$0xff]  ;;  %v53_v22 = vld [vmem:[%s1756_s0 + $0x130] sm:$0xff]  ;;  %v23_v24 = vld [vmem:[%s1756_s0 + $0x40] sm:$0xff] }
   0x7   :  { %1109 = vmatpush3.bf16.msra.mxu0 %v1179_v1  ;;  %1177 = vmatpush3.bf16.msra.mxu1 %v1179_v1  ;;  %v54_v23 = vld [vmem:[%s1756_s0 + $0x138] sm:$0xff]  ;;  %v24_v25 = vld [vmem:[%s1756_s0 + $0x48] sm:$0xff]  ;;  %v55_v26 = vld [vmem:[%s1756_s0 + $0x140] sm:$0xff]  ;;  %v82_v28 = vpack.c.bf16 %v22_v21, %v21_v20 }
   0x8   :  { %v56_v27 = vld [vmem:[%s1756_s0 + $0x148] sm:$0xff]  ;;  %v98_v29 = vpack.c.bf16 %v54_v23, %v53_v22  ;;  %v83_v30 = vpack.c.bf16 %v24_v25, %v23_v24  ;;  %v25_v32 = vld [vmem:[%s1756_s0 + $0x50] sm:$0xff]  ;;  %v26_v33 = vld [vmem:[%s1756_s0 + $0x58] sm:$0xff] }
   0x9   :  { %v99_v31 = vpack.c.bf16 %v56_v27, %v55_v26  ;;  %v57_v34 = vld [vmem:[%s1756_s0 + $0x150] sm:$0xff]  ;;  %v58_v35 = vld [vmem:[%s1756_s0 + $0x158] sm:$0xff]  ;;  %v27_v36 = vld [vmem:[%s1756_s0 + $0x60] sm:$0xff]  ;;  %v84_v40 = vpack.c.bf16 %v26_v33, %v25_v32 }
   0xa   :  { %1111 = vmatmul.mubr.msk.bf16.vlgmr.msra.gmra.mrb[0].mxu0 %vm134_vm0, %v80_v16  ;;  %1143 = vmatmul.mubr.msk.bf16.vlgmr.msra.gmra.mrb[0].mxu1 %vm134_vm0, %v96_v17  ;;  %v28_v37 = vld [vmem:[%s1756_s0 + $0x68] sm:$0xff]  ;;  %v59_v38 = vld [vmem:[%s1756_s0 + $0x160] sm:$0xff]  ;;  %v100_v41 = vpack.c.bf16 %v58_v35, %v57_v34  ;;  %v29_v44 = vld [vmem:[%s1756_s0 + $0x70] sm:$0xff] }
   0xb   :  { %1114 = vmatprep.mubr.msk.bf16.mxu0 %vm134_vm0, %v81_v18  ;;  %1146 = vmatprep.mubr.msk.bf16.mxu1 %vm134_vm0, %v97_v19  ;;  %v60_v39 = vld [vmem:[%s1756_s0 + $0x168] sm:$0xff]  ;;  %v85_v42 = vpack.c.bf16 %v28_v37, %v27_v36  ;;  %v30_v45 = vld [vmem:[%s1756_s0 + $0x78] sm:$0xff]  ;;  %v61_v46 = vld [vmem:[%s1756_s0 + $0x170] sm:$0xff] }
   0xc   :  { %v101_v43 = vpack.c.bf16 %v60_v39, %v59_v38  ;;  %v62_v47 = vld [vmem:[%s1756_s0 + $0x178] sm:$0xff]  ;;  %v31_v48 = vld [vmem:[%s1756_s0 + $0x80] sm:$0xff]  ;;  %v32_v49 = vld [vmem:[%s1756_s0 + $0x88] sm:$0xff]  ;;  %v86_v52 = vpack.c.bf16 %v30_v45, %v29_v44 }
   0xd   :  { %v63_v50 = vld [vmem:[%s1756_s0 + $0x180] sm:$0xff]  ;;  %v64_v51 = vld [vmem:[%s1756_s0 + $0x188] sm:$0xff]  ;;  %v102_v53 = vpack.c.bf16 %v62_v47, %v61_v46  ;;  %v87_v54 = vpack.c.bf16 %v32_v49, %v31_v48  ;;  %v33_v56 = vld [vmem:[%s1756_s0 + $0x90] sm:$0xff] }
   0xe   :  { %v103_v55 = vpack.c.bf16 %v64_v51, %v63_v50  ;;  %v34_v57 = vld [vmem:[%s1756_s0 + $0x98] sm:$0xff]  ;;  %v65_v58 = vld [vmem:[%s1756_s0 + $0x190] sm:$0xff]  ;;  %v35_v60 = vld [vmem:[%s1756_s0 + $0xa0] sm:$0xff] }
   0xf   :  { %v66_v59 = vld [vmem:[%s1756_s0 + $0x198] sm:$0xff]  ;;  %v36_v61 = vld [vmem:[%s1756_s0 + $0xa8] sm:$0xff]  ;;  %v67_v62 = vld [vmem:[%s1756_s0 + $0x1a0] sm:$0xff]  ;;  %v88_v0 = vpack.c.bf16 %v34_v57, %v33_v56 }
  0x10   :  { %v68_v63 = vld [vmem:[%s1756_s0 + $0x1a8] sm:$0xff]  ;;  %v104_v1 = vpack.c.bf16 %v66_v59, %v65_v58  ;;  %v89_v2 = vpack.c.bf16 %v36_v61, %v35_v60  ;;  %v37_v4 = vld [vmem:[%s1756_s0 + $0xb0] sm:$0xff]  ;;  %v38_v5 = vld [vmem:[%s1756_s0 + $0xb8] sm:$0xff] }
  0x11   :  { %v105_v3 = vpack.c.bf16 %v68_v63, %v67_v62  ;;  %v69_v6 = vld [vmem:[%s1756_s0 + $0x1b0] sm:$0xff]  ;;  %v70_v7 = vld [vmem:[%s1756_s0 + $0x1b8] sm:$0xff]  ;;  %v39_v8 = vld [vmem:[%s1756_s0 + $0xc0] sm:$0xff]  ;;  %v90_v12 = vpack.c.bf16 %v38_v5, %v37_v4 }
  0x12   :  { %1115 = vmatmul.mubr.msk.bf16.gmra.mrb[4].mxu0 %vm134_vm0, %v82_v28  ;;  %1147 = vmatmul.mubr.msk.bf16.gmra.mrb[4].mxu1 %vm134_vm0, %v98_v29  ;;  %v40_v9 = vld [vmem:[%s1756_s0 + $0xc8] sm:$0xff]  ;;  %v71_v10 = vld [vmem:[%s1756_s0 + $0x1c0] sm:$0xff]  ;;  %v106_v13 = vpack.c.bf16 %v70_v7, %v69_v6  ;;  %v41_v16 = vld [vmem:[%s1756_s0 + $0xd0] sm:$0xff] }
  0x13   :  { %1118 = vmatprep.mubr.msk.bf16.mxu0 %vm134_vm0, %v83_v30  ;;  %1150 = vmatprep.mubr.msk.bf16.mxu1 %vm134_vm0, %v99_v31  ;;  %v72_v11 = vld [vmem:[%s1756_s0 + $0x1c8] sm:$0xff]  ;;  %v91_v14 = vpack.c.bf16 %v40_v9, %v39_v8  ;;  %v42_v17 = vld [vmem:[%s1756_s0 + $0xd8] sm:$0xff]  ;;  %v73_v18 = vld [vmem:[%s1756_s0 + $0x1d0] sm:$0xff] }
  0x14   :  { %v107_v15 = vpack.c.bf16 %v72_v11, %v71_v10  ;;  %v74_v19 = vld [vmem:[%s1756_s0 + $0x1d8] sm:$0xff]  ;;  %v43_v20 = vld [vmem:[%s1756_s0 + $0xe0] sm:$0xff]  ;;  %v44_v21 = vld [vmem:[%s1756_s0 + $0xe8] sm:$0xff]  ;;  %v92_v24 = vpack.c.bf16 %v42_v17, %v41_v16 }
  0x15   :  { %v75_v22 = vld [vmem:[%s1756_s0 + $0x1e0] sm:$0xff]  ;;  %v76_v23 = vld [vmem:[%s1756_s0 + $0x1e8] sm:$0xff]  ;;  %v108_v25 = vpack.c.bf16 %v74_v19, %v73_v18  ;;  %v93_v26 = vpack.c.bf16 %v44_v21, %v43_v20  ;;  %v45_v28 = vld [vmem:[%s1756_s0 + $0xf0] sm:$0xff] }
  0x16   :  { %v109_v27 = vpack.c.bf16 %v76_v23, %v75_v22  ;;  %v46_v29 = vld [vmem:[%s1756_s0 + $0xf8] sm:$0xff]  ;;  %v77_v30 = vld [vmem:[%s1756_s0 + $0x1f0] sm:$0xff]  ;;  %v1433_v34 = vld [vmem:[%s1757_s2] ss:$0 sm:$0xff] }
  0x17   :  { %v78_v31 = vld [vmem:[%s1756_s0 + $0x1f8] sm:$0xff]  ;;  %v94_v32 = vpack.c.bf16 %v46_v29, %v45_v28 }
  0x18   :  { %v110_v33 = vpack.c.bf16 %v78_v31, %v77_v30 }
  0x1a   :  { %1119 = vmatmul.mubr.msk.bf16.gmra.mrb[8].mxu0 %vm134_vm0, %v84_v40  ;;  %1151 = vmatmul.mubr.msk.bf16.gmra.mrb[8].mxu1 %vm134_vm0, %v100_v41 }
  0x1b   :  { %1122 = vmatprep.mubr.msk.bf16.mxu0 %vm134_vm0, %v85_v42  ;;  %1154 = vmatprep.mubr.msk.bf16.mxu1 %vm134_vm0, %v101_v43 }
  0x22   :  { %1123 = vmatmul.mubr.msk.bf16.gmra.mrb[12].mxu0 %vm134_vm0, %v86_v52  ;;  %1155 = vmatmul.mubr.msk.bf16.gmra.mrb[12].mxu1 %vm134_vm0, %v102_v53 }
  0x23   :  { %1126 = vmatprep.mubr.msk.bf16.mxu0 %vm134_vm0, %v87_v54  ;;  %1158 = vmatprep.mubr.msk.bf16.mxu1 %vm134_vm0, %v103_v55 }
  0x2a   :  { %1127 = vmatmul.mubr.msk.bf16.gmra.mrb[16].mxu0 %vm134_vm0, %v88_v0  ;;  %1159 = vmatmul.mubr.msk.bf16.gmra.mrb[16].mxu1 %vm134_vm0, %v104_v1 }
  0x2b   :  { %1130 = vmatprep.mubr.msk.bf16.mxu0 %vm134_vm0, %v89_v2  ;;  %1162 = vmatprep.mubr.msk.bf16.mxu1 %vm134_vm0, %v105_v3 }
  0x32   :  { %1131 = vmatmul.mubr.msk.bf16.gmra.mrb[20].mxu0 %vm134_vm0, %v90_v12  ;;  %1163 = vmatmul.mubr.msk.bf16.gmra.mrb[20].mxu1 %vm134_vm0, %v106_v13 }
  0x33   :  { %1134 = vmatprep.mubr.msk.bf16.mxu0 %vm134_vm0, %v91_v14  ;;  %1166 = vmatprep.mubr.msk.bf16.mxu1 %vm134_vm0, %v107_v15 }
  0x3a   :  { %1135 = vmatmul.mubr.msk.bf16.gmra.mrb[24].mxu0 %vm134_vm0, %v92_v24  ;;  %1167 = vmatmul.mubr.msk.bf16.gmra.mrb[24].mxu1 %vm134_vm0, %v108_v25 }
  0x3b   :  { %1138 = vmatprep.mubr.msk.bf16.mxu0 %vm134_vm0, %v93_v26  ;;  %1170 = vmatprep.mubr.msk.bf16.mxu1 %vm134_vm0, %v109_v27 }
  0x42   :  { %1139 = vmatmul.mubr.msk.bf16.gmra.mrb[28].mxu0 %vm134_vm0, %v94_v32  ;;  %1171 = vmatmul.mubr.msk.bf16.gmra.mrb[28].mxu1 %vm134_vm0, %v110_v33 }
  0xdd   :  { %v1112_v35 = vpop.f32.mrb[0].mxu0  ;;  %v1144_v36 = vpop.f32.mrb[0].mxu1 }
  0xde   :  { %v274_v37 = vadd.f32 %v1112_v35, %v1433_v34  ;;  %v402_v38 = vadd.f32 %v1144_v36, %v1433_v34  ;;  %v265_v39 = vpop.f32.mrb[1].mxu0  ;;  %v393_v40 = vpop.f32.mrb[1].mxu1 }
  0xdf   :  { %v266_v41 = vadd.f32 %v1433_v34, %v265_v39  ;;  %v394_v42 = vadd.f32 %v1433_v34, %v393_v40  ;;  %v1113_v43 = vpop.f32.mrb[2].mxu0  ;;  %v1145_v44 = vpop.f32.mrb[2].mxu1 }
  0xe0   :  { %v522_v45 = vmax.f32 %v274_v37, 0.0  ;;  %v554_v46 = vmax.f32 %v402_v38, 0.0  ;;  %v277_v47 = vadd.f32 %v1113_v43, %v1433_v34  ;;  %v405_v48 = vadd.f32 %v1145_v44, %v1433_v34  ;;  %v268_v49 = vpop.f32.mrb[3].mxu0  ;;  %v396_v50 = vpop.f32.mrb[3].mxu1 }
  0xe1   :  { %v520_v51 = vmax.f32 %v266_v41, 0.0  ;;  %v552_v52 = vmax.f32 %v394_v42, 0.0  ;;  %v269_v53 = vadd.f32 %v1433_v34, %v268_v49  ;;  %v397_v54 = vadd.f32 %v1433_v34, %v396_v50 }
  0xe2   :  { %v1010_v55 = vpack.c.bf16 %v522_v45, %v522_v45  ;;  %v1042_v56 = vpack.c.bf16 %v554_v46, %v554_v46  ;;  %v523_v57 = vmax.f32 %v277_v47, 0.0  ;;  %v555_v58 = vmax.f32 %v405_v48, 0.0 }
  0xe3   :  { %v1008_v59 = vpack.c.bf16 %v520_v51, %v520_v51  ;;  %v1040_v60 = vpack.c.bf16 %v552_v52, %v552_v52  ;;  %v521_v61 = vmax.f32 %v269_v53, 0.0  ;;  %v553_v62 = vmax.f32 %v397_v54, 0.0 }
  0xe4   :  { %843 = vst.msk [vmem:[%s1758_s3 + $0x8] sm:$0xf] %vm840_vm1, %v1010_v55  ;;  %875 = vst.msk [vmem:[%s1758_s3 + $0x88] sm:$0xf] %vm840_vm1, %v1042_v56  ;;  %v1011_v63 = vpack.c.bf16 %v523_v57, %v523_v57  ;;  %v1043_v0 = vpack.c.bf16 %v555_v58, %v555_v58 }
  0xe5   :  { %841 = vst.msk [vmem:[%s1758_s3] sm:$0xf] %vm840_vm1, %v1008_v59  ;;  %873 = vst.msk [vmem:[%s1758_s3 + $0x80] sm:$0xf] %vm840_vm1, %v1040_v60  ;;  %v1009_v1 = vpack.c.bf16 %v521_v61, %v521_v61  ;;  %v1041_v2 = vpack.c.bf16 %v553_v62, %v553_v62  ;;  %v1116_v3 = vpop.f32.mrb[4].mxu0  ;;  %v1148_v4 = vpop.f32.mrb[4].mxu1 }
  0xe6   :  { %844 = vst.msk [vmem:[%s1758_s3 + $0xc] sm:$0xf] %vm840_vm1, %v1011_v63  ;;  %876 = vst.msk [vmem:[%s1758_s3 + $0x8c] sm:$0xf] %vm840_vm1, %v1043_v0  ;;  %v290_v5 = vadd.f32 %v1116_v3, %v1433_v34  ;;  %v418_v6 = vadd.f32 %v1148_v4, %v1433_v34  ;;  %v281_v7 = vpop.f32.mrb[5].mxu0  ;;  %v409_v8 = vpop.f32.mrb[5].mxu1 }
  0xe7   :  { %842 = vst.msk [vmem:[%s1758_s3 + $0x4] sm:$0xf] %vm840_vm1, %v1009_v1  ;;  %874 = vst.msk [vmem:[%s1758_s3 + $0x84] sm:$0xf] %vm840_vm1, %v1041_v2  ;;  %v282_v9 = vadd.f32 %v1433_v34, %v281_v7  ;;  %v410_v10 = vadd.f32 %v1433_v34, %v409_v8  ;;  %v1117_v11 = vpop.f32.mrb[6].mxu0  ;;  %v1149_v12 = vpop.f32.mrb[6].mxu1 }
  0xe8   :  { %v526_v13 = vmax.f32 %v290_v5, 0.0  ;;  %v558_v14 = vmax.f32 %v418_v6, 0.0  ;;  %v293_v15 = vadd.f32 %v1117_v11, %v1433_v34  ;;  %v421_v16 = vadd.f32 %v1149_v12, %v1433_v34  ;;  %v284_v17 = vpop.f32.mrb[7].mxu0  ;;  %v412_v18 = vpop.f32.mrb[7].mxu1 }
  0xe9   :  { %v524_v19 = vmax.f32 %v282_v9, 0.0  ;;  %v556_v20 = vmax.f32 %v410_v10, 0.0  ;;  %v285_v21 = vadd.f32 %v1433_v34, %v284_v17  ;;  %v413_v22 = vadd.f32 %v1433_v34, %v412_v18 }
  0xea   :  { %v1014_v23 = vpack.c.bf16 %v526_v13, %v526_v13  ;;  %v1046_v24 = vpack.c.bf16 %v558_v14, %v558_v14  ;;  %v527_v25 = vmax.f32 %v293_v15, 0.0  ;;  %v559_v26 = vmax.f32 %v421_v16, 0.0 }
  0xeb   :  { %v1012_v27 = vpack.c.bf16 %v524_v19, %v524_v19  ;;  %v1044_v28 = vpack.c.bf16 %v556_v20, %v556_v20  ;;  %v525_v29 = vmax.f32 %v285_v21, 0.0  ;;  %v557_v30 = vmax.f32 %v413_v22, 0.0 }
  0xec   :  { %847 = vst.msk [vmem:[%s1758_s3 + $0x18] sm:$0xf] %vm840_vm1, %v1014_v23  ;;  %879 = vst.msk [vmem:[%s1758_s3 + $0x98] sm:$0xf] %vm840_vm1, %v1046_v24  ;;  %v1015_v31 = vpack.c.bf16 %v527_v25, %v527_v25  ;;  %v1047_v32 = vpack.c.bf16 %v559_v26, %v559_v26 }
  0xed   :  { %845 = vst.msk [vmem:[%s1758_s3 + $0x10] sm:$0xf] %vm840_vm1, %v1012_v27  ;;  %877 = vst.msk [vmem:[%s1758_s3 + $0x90] sm:$0xf] %vm840_vm1, %v1044_v28  ;;  %v1013_v33 = vpack.c.bf16 %v525_v29, %v525_v29  ;;  %v1045_v35 = vpack.c.bf16 %v557_v30, %v557_v30  ;;  %v1120_v36 = vpop.f32.mrb[8].mxu0  ;;  %v1152_v37 = vpop.f32.mrb[8].mxu1 }
  0xee   :  { %848 = vst.msk [vmem:[%s1758_s3 + $0x1c] sm:$0xf] %vm840_vm1, %v1015_v31  ;;  %880 = vst.msk [vmem:[%s1758_s3 + $0x9c] sm:$0xf] %vm840_vm1, %v1047_v32  ;;  %v306_v38 = vadd.f32 %v1120_v36, %v1433_v34  ;;  %v434_v39 = vadd.f32 %v1152_v37, %v1433_v34  ;;  %v297_v40 = vpop.f32.mrb[9].mxu0  ;;  %v425_v41 = vpop.f32.mrb[9].mxu1 }
  0xef   :  { %846 = vst.msk [vmem:[%s1758_s3 + $0x14] sm:$0xf] %vm840_vm1, %v1013_v33  ;;  %878 = vst.msk [vmem:[%s1758_s3 + $0x94] sm:$0xf] %vm840_vm1, %v1045_v35  ;;  %v298_v42 = vadd.f32 %v1433_v34, %v297_v40  ;;  %v426_v43 = vadd.f32 %v1433_v34, %v425_v41  ;;  %v1121_v44 = vpop.f32.mrb[10].mxu0  ;;  %v1153_v45 = vpop.f32.mrb[10].mxu1 }
  0xf0   :  { %v530_v46 = vmax.f32 %v306_v38, 0.0  ;;  %v562_v47 = vmax.f32 %v434_v39, 0.0  ;;  %v309_v48 = vadd.f32 %v1121_v44, %v1433_v34  ;;  %v437_v49 = vadd.f32 %v1153_v45, %v1433_v34  ;;  %v300_v50 = vpop.f32.mrb[11].mxu0  ;;  %v428_v51 = vpop.f32.mrb[11].mxu1 }
  0xf1   :  { %v528_v52 = vmax.f32 %v298_v42, 0.0  ;;  %v560_v53 = vmax.f32 %v426_v43, 0.0  ;;  %v301_v54 = vadd.f32 %v1433_v34, %v300_v50  ;;  %v429_v55 = vadd.f32 %v1433_v34, %v428_v51 }
  0xf2   :  { %v1018_v56 = vpack.c.bf16 %v530_v46, %v530_v46  ;;  %v1050_v57 = vpack.c.bf16 %v562_v47, %v562_v47  ;;  %v531_v58 = vmax.f32 %v309_v48, 0.0  ;;  %v563_v59 = vmax.f32 %v437_v49, 0.0 }
  0xf3   :  { %v1016_v60 = vpack.c.bf16 %v528_v52, %v528_v52  ;;  %v1048_v61 = vpack.c.bf16 %v560_v53, %v560_v53  ;;  %v529_v62 = vmax.f32 %v301_v54, 0.0  ;;  %v561_v63 = vmax.f32 %v429_v55, 0.0 }
  0xf4   :  { %851 = vst.msk [vmem:[%s1758_s3 + $0x28] sm:$0xf] %vm840_vm1, %v1018_v56  ;;  %883 = vst.msk [vmem:[%s1758_s3 + $0xa8] sm:$0xf] %vm840_vm1, %v1050_v57  ;;  %v1019_v0 = vpack.c.bf16 %v531_v58, %v531_v58  ;;  %v1051_v1 = vpack.c.bf16 %v563_v59, %v563_v59 }
  0xf5   :  { %849 = vst.msk [vmem:[%s1758_s3 + $0x20] sm:$0xf] %vm840_vm1, %v1016_v60  ;;  %881 = vst.msk [vmem:[%s1758_s3 + $0xa0] sm:$0xf] %vm840_vm1, %v1048_v61  ;;  %v1017_v2 = vpack.c.bf16 %v529_v62, %v529_v62  ;;  %v1049_v3 = vpack.c.bf16 %v561_v63, %v561_v63  ;;  %v1124_v4 = vpop.f32.mrb[12].mxu0  ;;  %v1156_v5 = vpop.f32.mrb[12].mxu1 }
  0xf6   :  { %852 = vst.msk [vmem:[%s1758_s3 + $0x2c] sm:$0xf] %vm840_vm1, %v1019_v0  ;;  %884 = vst.msk [vmem:[%s1758_s3 + $0xac] sm:$0xf] %vm840_vm1, %v1051_v1  ;;  %v322_v6 = vadd.f32 %v1124_v4, %v1433_v34  ;;  %v450_v7 = vadd.f32 %v1156_v5, %v1433_v34  ;;  %v313_v8 = vpop.f32.mrb[13].mxu0  ;;  %v441_v9 = vpop.f32.mrb[13].mxu1 }
  0xf7   :  { %850 = vst.msk [vmem:[%s1758_s3 + $0x24] sm:$0xf] %vm840_vm1, %v1017_v2  ;;  %882 = vst.msk [vmem:[%s1758_s3 + $0xa4] sm:$0xf] %vm840_vm1, %v1049_v3  ;;  %v314_v10 = vadd.f32 %v1433_v34, %v313_v8  ;;  %v442_v11 = vadd.f32 %v1433_v34, %v441_v9  ;;  %v1125_v12 = vpop.f32.mrb[14].mxu0  ;;  %v1157_v13 = vpop.f32.mrb[14].mxu1 }
  0xf8   :  { %v534_v14 = vmax.f32 %v322_v6, 0.0  ;;  %v566_v15 = vmax.f32 %v450_v7, 0.0  ;;  %v325_v16 = vadd.f32 %v1125_v12, %v1433_v34  ;;  %v453_v17 = vadd.f32 %v1157_v13, %v1433_v34  ;;  %v316_v18 = vpop.f32.mrb[15].mxu0  ;;  %v444_v19 = vpop.f32.mrb[15].mxu1 }
  0xf9   :  { %v532_v20 = vmax.f32 %v314_v10, 0.0  ;;  %v564_v21 = vmax.f32 %v442_v11, 0.0  ;;  %v317_v22 = vadd.f32 %v1433_v34, %v316_v18  ;;  %v445_v23 = vadd.f32 %v1433_v34, %v444_v19 }
  0xfa   :  { %v1022_v24 = vpack.c.bf16 %v534_v14, %v534_v14  ;;  %v1054_v25 = vpack.c.bf16 %v566_v15, %v566_v15  ;;  %v535_v26 = vmax.f32 %v325_v16, 0.0  ;;  %v567_v27 = vmax.f32 %v453_v17, 0.0 }
  0xfb   :  { %v1020_v28 = vpack.c.bf16 %v532_v20, %v532_v20  ;;  %v1052_v29 = vpack.c.bf16 %v564_v21, %v564_v21  ;;  %v533_v30 = vmax.f32 %v317_v22, 0.0  ;;  %v565_v31 = vmax.f32 %v445_v23, 0.0 }
  0xfc   :  { %855 = vst.msk [vmem:[%s1758_s3 + $0x38] sm:$0xf] %vm840_vm1, %v1022_v24  ;;  %887 = vst.msk [vmem:[%s1758_s3 + $0xb8] sm:$0xf] %vm840_vm1, %v1054_v25  ;;  %v1023_v32 = vpack.c.bf16 %v535_v26, %v535_v26  ;;  %v1055_v33 = vpack.c.bf16 %v567_v27, %v567_v27 }
  0xfd   :  { %853 = vst.msk [vmem:[%s1758_s3 + $0x30] sm:$0xf] %vm840_vm1, %v1020_v28  ;;  %885 = vst.msk [vmem:[%s1758_s3 + $0xb0] sm:$0xf] %vm840_vm1, %v1052_v29  ;;  %v1021_v35 = vpack.c.bf16 %v533_v30, %v533_v30  ;;  %v1053_v36 = vpack.c.bf16 %v565_v31, %v565_v31  ;;  %v1128_v37 = vpop.f32.mrb[16].mxu0  ;;  %v1160_v38 = vpop.f32.mrb[16].mxu1 }
  0xfe   :  { %856 = vst.msk [vmem:[%s1758_s3 + $0x3c] sm:$0xf] %vm840_vm1, %v1023_v32  ;;  %888 = vst.msk [vmem:[%s1758_s3 + $0xbc] sm:$0xf] %vm840_vm1, %v1055_v33  ;;  %v338_v39 = vadd.f32 %v1128_v37, %v1433_v34  ;;  %v466_v40 = vadd.f32 %v1160_v38, %v1433_v34  ;;  %v329_v41 = vpop.f32.mrb[17].mxu0  ;;  %v457_v42 = vpop.f32.mrb[17].mxu1 }
  0xff   :  { %854 = vst.msk [vmem:[%s1758_s3 + $0x34] sm:$0xf] %vm840_vm1, %v1021_v35  ;;  %886 = vst.msk [vmem:[%s1758_s3 + $0xb4] sm:$0xf] %vm840_vm1, %v1053_v36  ;;  %v330_v43 = vadd.f32 %v1433_v34, %v329_v41  ;;  %v458_v44 = vadd.f32 %v1433_v34, %v457_v42  ;;  %v1129_v45 = vpop.f32.mrb[18].mxu0  ;;  %v1161_v46 = vpop.f32.mrb[18].mxu1 }
 0x100   :  { %v538_v47 = vmax.f32 %v338_v39, 0.0  ;;  %v570_v48 = vmax.f32 %v466_v40, 0.0  ;;  %v341_v49 = vadd.f32 %v1129_v45, %v1433_v34  ;;  %v469_v50 = vadd.f32 %v1161_v46, %v1433_v34  ;;  %v332_v51 = vpop.f32.mrb[19].mxu0  ;;  %v460_v52 = vpop.f32.mrb[19].mxu1 }
 0x101   :  { %v536_v53 = vmax.f32 %v330_v43, 0.0  ;;  %v568_v54 = vmax.f32 %v458_v44, 0.0  ;;  %v333_v55 = vadd.f32 %v1433_v34, %v332_v51  ;;  %v461_v56 = vadd.f32 %v1433_v34, %v460_v52 }
 0x102   :  { %v1026_v57 = vpack.c.bf16 %v538_v47, %v538_v47  ;;  %v1058_v58 = vpack.c.bf16 %v570_v48, %v570_v48  ;;  %v539_v59 = vmax.f32 %v341_v49, 0.0  ;;  %v571_v60 = vmax.f32 %v469_v50, 0.0 }
 0x103   :  { %v1024_v61 = vpack.c.bf16 %v536_v53, %v536_v53  ;;  %v1056_v62 = vpack.c.bf16 %v568_v54, %v568_v54  ;;  %v537_v63 = vmax.f32 %v333_v55, 0.0  ;;  %v569_v0 = vmax.f32 %v461_v56, 0.0 }
 0x104   :  { %859 = vst.msk [vmem:[%s1758_s3 + $0x48] sm:$0xf] %vm840_vm1, %v1026_v57  ;;  %891 = vst.msk [vmem:[%s1758_s3 + $0xc8] sm:$0xf] %vm840_vm1, %v1058_v58  ;;  %v1027_v1 = vpack.c.bf16 %v539_v59, %v539_v59  ;;  %v1059_v2 = vpack.c.bf16 %v571_v60, %v571_v60 }
 0x105   :  { %857 = vst.msk [vmem:[%s1758_s3 + $0x40] sm:$0xf] %vm840_vm1, %v1024_v61  ;;  %889 = vst.msk [vmem:[%s1758_s3 + $0xc0] sm:$0xf] %vm840_vm1, %v1056_v62  ;;  %v1025_v3 = vpack.c.bf16 %v537_v63, %v537_v63  ;;  %v1057_v4 = vpack.c.bf16 %v569_v0, %v569_v0  ;;  %v1132_v5 = vpop.f32.mrb[20].mxu0  ;;  %v1164_v6 = vpop.f32.mrb[20].mxu1 }
 0x106   :  { %860 = vst.msk [vmem:[%s1758_s3 + $0x4c] sm:$0xf] %vm840_vm1, %v1027_v1  ;;  %892 = vst.msk [vmem:[%s1758_s3 + $0xcc] sm:$0xf] %vm840_vm1, %v1059_v2  ;;  %v354_v7 = vadd.f32 %v1132_v5, %v1433_v34  ;;  %v482_v8 = vadd.f32 %v1164_v6, %v1433_v34  ;;  %v345_v9 = vpop.f32.mrb[21].mxu0  ;;  %v473_v10 = vpop.f32.mrb[21].mxu1 }
 0x107   :  { %858 = vst.msk [vmem:[%s1758_s3 + $0x44] sm:$0xf] %vm840_vm1, %v1025_v3  ;;  %890 = vst.msk [vmem:[%s1758_s3 + $0xc4] sm:$0xf] %vm840_vm1, %v1057_v4  ;;  %v346_v11 = vadd.f32 %v1433_v34, %v345_v9  ;;  %v474_v12 = vadd.f32 %v1433_v34, %v473_v10  ;;  %v1133_v13 = vpop.f32.mrb[22].mxu0  ;;  %v1165_v14 = vpop.f32.mrb[22].mxu1 }
 0x108   :  { %v542_v15 = vmax.f32 %v354_v7, 0.0  ;;  %v574_v16 = vmax.f32 %v482_v8, 0.0  ;;  %v357_v17 = vadd.f32 %v1133_v13, %v1433_v34  ;;  %v485_v18 = vadd.f32 %v1165_v14, %v1433_v34  ;;  %v348_v19 = vpop.f32.mrb[23].mxu0  ;;  %v476_v20 = vpop.f32.mrb[23].mxu1 }
 0x109   :  { %v540_v21 = vmax.f32 %v346_v11, 0.0  ;;  %v572_v22 = vmax.f32 %v474_v12, 0.0  ;;  %v349_v23 = vadd.f32 %v1433_v34, %v348_v19  ;;  %v477_v24 = vadd.f32 %v1433_v34, %v476_v20 }
 0x10a   :  { %v1030_v25 = vpack.c.bf16 %v542_v15, %v542_v15  ;;  %v1062_v26 = vpack.c.bf16 %v574_v16, %v574_v16  ;;  %v543_v27 = vmax.f32 %v357_v17, 0.0  ;;  %v575_v28 = vmax.f32 %v485_v18, 0.0 }
 0x10b   :  { %v1028_v29 = vpack.c.bf16 %v540_v21, %v540_v21  ;;  %v1060_v30 = vpack.c.bf16 %v572_v22, %v572_v22  ;;  %v541_v31 = vmax.f32 %v349_v23, 0.0  ;;  %v573_v32 = vmax.f32 %v477_v24, 0.0 }
 0x10c   :  { %863 = vst.msk [vmem:[%s1758_s3 + $0x58] sm:$0xf] %vm840_vm1, %v1030_v25  ;;  %895 = vst.msk [vmem:[%s1758_s3 + $0xd8] sm:$0xf] %vm840_vm1, %v1062_v26  ;;  %v1031_v33 = vpack.c.bf16 %v543_v27, %v543_v27  ;;  %v1063_v35 = vpack.c.bf16 %v575_v28, %v575_v28 }
 0x10d   :  { %861 = vst.msk [vmem:[%s1758_s3 + $0x50] sm:$0xf] %vm840_vm1, %v1028_v29  ;;  %893 = vst.msk [vmem:[%s1758_s3 + $0xd0] sm:$0xf] %vm840_vm1, %v1060_v30  ;;  %v1029_v36 = vpack.c.bf16 %v541_v31, %v541_v31  ;;  %v1061_v37 = vpack.c.bf16 %v573_v32, %v573_v32  ;;  %v1136_v38 = vpop.f32.mrb[24].mxu0  ;;  %v1168_v39 = vpop.f32.mrb[24].mxu1 }
 0x10e   :  { %864 = vst.msk [vmem:[%s1758_s3 + $0x5c] sm:$0xf] %vm840_vm1, %v1031_v33  ;;  %896 = vst.msk [vmem:[%s1758_s3 + $0xdc] sm:$0xf] %vm840_vm1, %v1063_v35  ;;  %v370_v40 = vadd.f32 %v1136_v38, %v1433_v34  ;;  %v498_v41 = vadd.f32 %v1168_v39, %v1433_v34  ;;  %v361_v42 = vpop.f32.mrb[25].mxu0  ;;  %v489_v43 = vpop.f32.mrb[25].mxu1 }
 0x10f   :  { %862 = vst.msk [vmem:[%s1758_s3 + $0x54] sm:$0xf] %vm840_vm1, %v1029_v36  ;;  %894 = vst.msk [vmem:[%s1758_s3 + $0xd4] sm:$0xf] %vm840_vm1, %v1061_v37  ;;  %v362_v44 = vadd.f32 %v1433_v34, %v361_v42  ;;  %v490_v45 = vadd.f32 %v1433_v34, %v489_v43  ;;  %v1137_v46 = vpop.f32.mrb[26].mxu0  ;;  %v1169_v47 = vpop.f32.mrb[26].mxu1 }
 0x110   :  { %v546_v48 = vmax.f32 %v370_v40, 0.0  ;;  %v578_v49 = vmax.f32 %v498_v41, 0.0  ;;  %v373_v50 = vadd.f32 %v1137_v46, %v1433_v34  ;;  %v501_v51 = vadd.f32 %v1169_v47, %v1433_v34  ;;  %v364_v52 = vpop.f32.mrb[27].mxu0  ;;  %v492_v53 = vpop.f32.mrb[27].mxu1 }
 0x111   :  { %v544_v54 = vmax.f32 %v362_v44, 0.0  ;;  %v576_v55 = vmax.f32 %v490_v45, 0.0  ;;  %v365_v56 = vadd.f32 %v1433_v34, %v364_v52  ;;  %v493_v57 = vadd.f32 %v1433_v34, %v492_v53 }
 0x112   :  { %v1034_v58 = vpack.c.bf16 %v546_v48, %v546_v48  ;;  %v1066_v59 = vpack.c.bf16 %v578_v49, %v578_v49  ;;  %v547_v60 = vmax.f32 %v373_v50, 0.0  ;;  %v579_v61 = vmax.f32 %v501_v51, 0.0 }
 0x113   :  { %v1032_v62 = vpack.c.bf16 %v544_v54, %v544_v54  ;;  %v1064_v63 = vpack.c.bf16 %v576_v55, %v576_v55  ;;  %v545_v0 = vmax.f32 %v365_v56, 0.0  ;;  %v577_v1 = vmax.f32 %v493_v57, 0.0 }
 0x114   :  { %867 = vst.msk [vmem:[%s1758_s3 + $0x68] sm:$0xf] %vm840_vm1, %v1034_v58  ;;  %899 = vst.msk [vmem:[%s1758_s3 + $0xe8] sm:$0xf] %vm840_vm1, %v1066_v59  ;;  %v1035_v2 = vpack.c.bf16 %v547_v60, %v547_v60  ;;  %v1067_v3 = vpack.c.bf16 %v579_v61, %v579_v61 }
 0x115   :  { %865 = vst.msk [vmem:[%s1758_s3 + $0x60] sm:$0xf] %vm840_vm1, %v1032_v62  ;;  %897 = vst.msk [vmem:[%s1758_s3 + $0xe0] sm:$0xf] %vm840_vm1, %v1064_v63  ;;  %v1033_v4 = vpack.c.bf16 %v545_v0, %v545_v0  ;;  %v1065_v5 = vpack.c.bf16 %v577_v1, %v577_v1  ;;  %v1140_v6 = vpop.f32.mrb[28].mxu0  ;;  %v1172_v7 = vpop.f32.mrb[28].mxu1 }
 0x116   :  { %868 = vst.msk [vmem:[%s1758_s3 + $0x6c] sm:$0xf] %vm840_vm1, %v1035_v2  ;;  %900 = vst.msk [vmem:[%s1758_s3 + $0xec] sm:$0xf] %vm840_vm1, %v1067_v3  ;;  %v386_v8 = vadd.f32 %v1140_v6, %v1433_v34  ;;  %v514_v9 = vadd.f32 %v1172_v7, %v1433_v34  ;;  %v377_v10 = vpop.f32.mrb[29].mxu0  ;;  %v505_v11 = vpop.f32.mrb[29].mxu1 }
 0x117   :  { %866 = vst.msk [vmem:[%s1758_s3 + $0x64] sm:$0xf] %vm840_vm1, %v1033_v4  ;;  %898 = vst.msk [vmem:[%s1758_s3 + $0xe4] sm:$0xf] %vm840_vm1, %v1065_v5  ;;  %v378_v12 = vadd.f32 %v1433_v34, %v377_v10  ;;  %v506_v13 = vadd.f32 %v1433_v34, %v505_v11  ;;  %v1141_v14 = vpop.f32.mrb[30].mxu0  ;;  %v1173_v15 = vpop.f32.mrb[30].mxu1 }
 0x118   :  { %v550_v16 = vmax.f32 %v386_v8, 0.0  ;;  %v582_v17 = vmax.f32 %v514_v9, 0.0  ;;  %v389_v18 = vadd.f32 %v1141_v14, %v1433_v34  ;;  %v517_v19 = vadd.f32 %v1173_v15, %v1433_v34  ;;  %v380_v20 = vpop.f32.mrb[31].mxu0  ;;  %v508_v21 = vpop.f32.mrb[31].mxu1 }
 0x119   :  { %v548_v22 = vmax.f32 %v378_v12, 0.0  ;;  %v580_v23 = vmax.f32 %v506_v13, 0.0  ;;  %v381_v24 = vadd.f32 %v1433_v34, %v380_v20  ;;  %v509_v25 = vadd.f32 %v1433_v34, %v508_v21 }
 0x11a   :  { %v1038_v26 = vpack.c.bf16 %v550_v16, %v550_v16  ;;  %v1070_v27 = vpack.c.bf16 %v582_v17, %v582_v17  ;;  %v551_v28 = vmax.f32 %v389_v18, 0.0  ;;  %v583_v29 = vmax.f32 %v517_v19, 0.0 }
 0x11b   :  { %v1036_v30 = vpack.c.bf16 %v548_v22, %v548_v22  ;;  %v1068_v31 = vpack.c.bf16 %v580_v23, %v580_v23  ;;  %v549_v32 = vmax.f32 %v381_v24, 0.0  ;;  %v581_v33 = vmax.f32 %v509_v25, 0.0 }
 0x11c   :  { %871 = vst.msk [vmem:[%s1758_s3 + $0x78] sm:$0xf] %vm840_vm1, %v1038_v26  ;;  %903 = vst.msk [vmem:[%s1758_s3 + $0xf8] sm:$0xf] %vm840_vm1, %v1070_v27  ;;  %v1039_v35 = vpack.c.bf16 %v551_v28, %v551_v28  ;;  %v1071_v34 = vpack.c.bf16 %v583_v29, %v583_v29 }
 0x11d   :  { %869 = vst.msk [vmem:[%s1758_s3 + $0x70] sm:$0xf] %vm840_vm1, %v1036_v30  ;;  %901 = vst.msk [vmem:[%s1758_s3 + $0xf0] sm:$0xf] %vm840_vm1, %v1068_v31  ;;  %v1037_v36 = vpack.c.bf16 %v549_v32, %v549_v32  ;;  %v1069_v37 = vpack.c.bf16 %v581_v33, %v581_v33 }
 0x11e   :  { %872 = vst.msk [vmem:[%s1758_s3 + $0x7c] sm:$0xf] %vm840_vm1, %v1039_v35  ;;  %904 = vst.msk [vmem:[%s1758_s3 + $0xfc] sm:$0xf] %vm840_vm1, %v1071_v34 }
 0x11f   :  { %870 = vst.msk [vmem:[%s1758_s3 + $0x74] sm:$0xf] %vm840_vm1, %v1037_v36  ;;  %902 = vst.msk [vmem:[%s1758_s3 + $0xf4] sm:$0xf] %vm840_vm1, %v1069_v37 }

</bundles_post_ra>
